<compile_context>
chip_gen: v6e
topology: v6e:2x2x1
jax: 0.10.0
libtpu: 0.0.40
codegen_flags: <defaults>
</compile_context>

<pallas_src>
import jax
import jax.numpy as jnp
from jax.experimental import pallas as pl
from jax.experimental.pallas import tpu as pltpu


def _round_up(x, m):
    return ((x + m - 1) // m) * m


def mlp_kernel(x_ref, w1_ref, b1_ref, w2_ref, b2_ref, w3_ref, b3_ref, o_ref):
    # In-kernel f32 -> bf16 cast (saves the wrapper-side HBM cast round trip).
    x = x_ref[...].astype(jnp.bfloat16)
    # fc1 + ReLU: bf16 operands on the MXU, f32 accumulation, f32 epilogue.
    h1 = jnp.dot(x, w1_ref[...], preferred_element_type=jnp.float32)
    h1 = jnp.maximum(h1 + b1_ref[...], 0.0).astype(jnp.bfloat16)
    # fc2 + ReLU.
    h2 = jnp.dot(h1, w2_ref[...], preferred_element_type=jnp.float32)
    h2 = jnp.maximum(h2 + b2_ref[...], 0.0).astype(jnp.bfloat16)
    # Fused per-feature heads: single (128, F) matmul, f32 result, narrow store.
    out = jnp.dot(h2, w3_ref[...], preferred_element_type=jnp.float32)
    o_ref[...] = (out + b3_ref[...]).astype(o_ref.dtype)


def multi_output_ffnn(x, params, block_b=2048):
    """x: (B, H, W) float32.  Returns (B, num_features) float32."""
    B = x.shape[0]
    x2d = x.reshape(B, -1)                    # torch.flatten(x, 1); no HBM copy
    w1, b1, w2, b2, w3, b3 = params
    d_in = x2d.shape[1]
    n_out = w3.shape[1]                       # == num_features

    # Batch tile: multiple of 16 rows (bf16 sublane packing), capped at block_b
    # (VMEM budget) and at ~B/2 so v7x's two TensorCores both see grid steps.
    tb = min(block_b, _round_up(pl.cdiv(B, 2), 16))
    grid = (pl.cdiv(B, tb),)                  # ragged last block; OOB rows masked

    resident = lambda i: (0, 0)               # weights/biases stay in VMEM
    in_specs = [
        pl.BlockSpec((tb, d_in), lambda i: (i, 0)),   # x tile (f32, cast in-kernel)
        pl.BlockSpec(w1.shape, resident),
        pl.BlockSpec(b1.shape, resident),
        pl.BlockSpec(w2.shape, resident),
        pl.BlockSpec(b2.shape, resident),
        pl.BlockSpec(w3.shape, resident),
        pl.BlockSpec(b3.shape, resident),
    ]
    out_spec = pl.BlockSpec((tb, n_out), lambda i: (i, 0))

    flops = 2 * B * (d_in * 256 + 256 * 128 + 128 * n_out)
    bytes_accessed = (
        x2d.size * x2d.dtype.itemsize
        + B * n_out * 4
        + sum(int(p.size) * p.dtype.itemsize for p in params)
    )

    return pl.pallas_call(
        mlp_kernel,
        out_shape=jax.ShapeDtypeStruct((B, n_out), jnp.float32),
        grid=grid,
        in_specs=in_specs,
        out_specs=out_spec,
        compiler_params=pltpu.CompilerParams(
            dimension_semantics=("parallel",),
            vmem_limit_bytes=64 * 1024 * 1024,
        ),
        cost_estimate=pl.CostEstimate(
            flops=flops, transcendentals=0, bytes_accessed=bytes_accessed),
    )(x2d, w1, b1, w2, b2, w3, b3)


def init_linear(key, fan_in, fan_out):
    """PyTorch nn.Linear default init: U(-1/sqrt(fan_in), 1/sqrt(fan_in)).

    Weight returned as (fan_in, fan_out) — pre-transposed for x @ W.
    Bias returned as (1, fan_out) for clean broadcasting inside the kernel.
    """
    kw, kb = jax.random.split(key)
    bound = 1.0 / jnp.sqrt(fan_in)
    w = jax.random.uniform(kw, (fan_in, fan_out), jnp.float32, -bound, bound)
    b = jax.random.uniform(kb, (1, fan_out), jnp.float32, -bound, bound)
    return w, b


def build_params(key, flat_input_size, features):
    k1, k2, *k_heads = jax.random.split(key, 2 + len(features))
    w1, b1 = init_linear(k1, flat_input_size, 256)
    w2, b2 = init_linear(k2, 256, 128)

    head_ws, head_bs = [], []
    for kh, (fkey, fvals) in zip(k_heads, features.items()):
        out_dim = fvals["num_classes"] if fvals["type"] == "categorical" else 1
        # The PyTorch module's torch.stack(outputs, 1).reshape(-1, F) only
        # works when every head emits exactly one value; guard so the fused
        # head matmul stays equivalent.
        assert out_dim == 1, (
            f"head '{fkey}' has out_dim={out_dim}; the reference module's "
            "torch.stack(...).reshape(-1, F) requires out_dim == 1")
        wh, bh = init_linear(kh, 128, out_dim)          # (128, 1), (1, 1)
        head_ws.append(wh)
        head_bs.append(bh)

    w3 = jnp.concatenate(head_ws, axis=1)               # (128, F)  — no lane padding
    b3 = jnp.concatenate(head_bs, axis=1)               # (1, F)

    # bf16 weights for the MXU; f32 biases (added post-accumulation).
    params = (
        w1.astype(jnp.bfloat16), b1,
        w2.astype(jnp.bfloat16), b2,
        w3.astype(jnp.bfloat16), b3,
    )
    return params


if __name__ == "__main__":
    # Module configuration (synthetic, deterministic).
    input_shape = (16, 16)                 # flat_input_size = 256
    features = {
        "feat_a": {"type": "numerical"},
        "feat_b": {"type": "numerical"},
        "feat_c": {"type": "categorical", "num_classes": 1},
        "feat_d": {"type": "numerical"},
    }
    num_features = len(features)
    flat_input_size = input_shape[0] * input_shape[1]
    B = 2

    key = jax.random.PRNGKey(0)
    k_x, k_params = jax.random.split(key)

    params = build_params(k_params, flat_input_size, features)

    # Input matching the PyTorch forward: (B, H, W), flattened inside wrapper.
    x = jax.random.normal(k_x, (B,) + input_shape, jnp.float32)

    out = multi_output_ffnn(x, params)
    out = jax.block_until_ready(out)
    assert out.shape == (B, num_features)

    w1, b1, w2, b2, w3, b3 = params
    x2d = x.reshape(B, -1)

    # Reference 1: same bf16-in / f32-accumulate precision as the kernel.
    xb = x2d.astype(jnp.bfloat16)
    h1 = jnp.maximum(
        jnp.dot(xb, w1, preferred_element_type=jnp.float32) + b1, 0.0
    ).astype(jnp.bfloat16)
    h2 = jnp.maximum(
        jnp.dot(h1, w2, preferred_element_type=jnp.float32) + b2, 0.0
    ).astype(jnp.bfloat16)
    ref_bf16 = jnp.dot(h2, w3, preferred_element_type=jnp.float32) + b3
    assert jnp.allclose(out, ref_bf16, atol=1e-3, rtol=1e-3), (
        f"max abs err vs bf16-matched reference: "
        f"{jnp.max(jnp.abs(out - ref_bf16))}")

    # Reference 2: full-fp32 math (the true PyTorch-module semantics); the
    # bf16 feed costs a few 1e-3 of absolute error, so compare loosely.
    h1f = jnp.maximum(jnp.dot(x2d, w1.astype(jnp.float32)) + b1, 0.0)
    h2f = jnp.maximum(jnp.dot(h1f, w2.astype(jnp.float32)) + b2, 0.0)
    ref_f32 = jnp.dot(h2f, w3.astype(jnp.float32)) + b3
    assert jnp.allclose(out, ref_f32, atol=5e-2, rtol=5e-2), (
        f"max abs err vs fp32 reference: {jnp.max(jnp.abs(out - ref_f32))}")

    print("KERNEL_OK")
</pallas_src>

<mosaic_0001>
module attributes {stable_mosaic.version = 11 : i64} {
  func.func @mlp_kernel(%arg0: i32, %arg1: memref<16x256xf32, #tpu.memory_space<vmem>>, %arg2: memref<256x256xbf16, #tpu.memory_space<vmem>>, %arg3: memref<1x256xf32, #tpu.memory_space<vmem>>, %arg4: memref<256x128xbf16, #tpu.memory_space<vmem>>, %arg5: memref<1x128xf32, #tpu.memory_space<vmem>>, %arg6: memref<128x4xbf16, #tpu.memory_space<vmem>>, %arg7: memref<1x4xf32, #tpu.memory_space<vmem>>, %arg8: memref<16x4xf32, #tpu.memory_space<vmem>>) attributes {dimension_semantics = [#tpu.dimension_semantics<parallel>], iteration_bounds = array<i64: 1>, scalar_prefetch = 0 : i64, scratch_operands = 0 : i64, tpu.core_type = #tpu.core_type<tc>, window_params = [{transform_indices = @transform_0, window_bounds = array<i64: 16, 256>}, {pipeline_mode = #tpu.pipeline_mode<synchronous>, transform_indices = @transform_1, window_bounds = array<i64: 256, 256>}, {pipeline_mode = #tpu.pipeline_mode<synchronous>, transform_indices = @transform_2, window_bounds = array<i64: 1, 256>}, {pipeline_mode = #tpu.pipeline_mode<synchronous>, transform_indices = @transform_3, window_bounds = array<i64: 256, 128>}, {pipeline_mode = #tpu.pipeline_mode<synchronous>, transform_indices = @transform_4, window_bounds = array<i64: 1, 128>}, {pipeline_mode = #tpu.pipeline_mode<synchronous>, transform_indices = @transform_5, window_bounds = array<i64: 128, 4>}, {pipeline_mode = #tpu.pipeline_mode<synchronous>, transform_indices = @transform_6, window_bounds = array<i64: 1, 4>}, {transform_indices = @transform_7, window_bounds = array<i64: 16, 4>}]} {
    %c0 = arith.constant 0 : index
    %c0_0 = arith.constant 0 : index
    %0 = vector.load %arg1[%c0, %c0_0] : memref<16x256xf32, #tpu.memory_space<vmem>>, vector<16x256xf32>
    %1 = arith.truncf %0 : vector<16x256xf32> to vector<16x256xbf16>
    %c0_1 = arith.constant 0 : index
    %c0_2 = arith.constant 0 : index
    %2 = vector.load %arg2[%c0_1, %c0_2] : memref<256x256xbf16, #tpu.memory_space<vmem>>, vector<256x256xbf16>
    %cst = arith.constant dense<0.000000e+00> : vector<16x256xf32>
    %3 = tpu.matmul %1, %2, %cst {dimension_numbers = #tpu.dot_dimension_numbers<[1], [0], [0], [1], [0, 0, 1, 1], [], []>} : vector<16x256xbf16>, vector<256x256xbf16>, vector<16x256xf32> -> vector<16x256xf32>
    %c0_3 = arith.constant 0 : index
    %c0_4 = arith.constant 0 : index
    %4 = vector.load %arg3[%c0_3, %c0_4] : memref<1x256xf32, #tpu.memory_space<vmem>>, vector<1x256xf32>
    %5 = vector.broadcast %4 : vector<1x256xf32> to vector<16x256xf32>
    %6 = arith.addf %3, %5 : vector<16x256xf32>
    %cst_5 = arith.constant 0.000000e+00 : f32
    %7 = vector.broadcast %cst_5 : f32 to vector<16x256xf32>
    %8 = arith.maximumf %6, %7 : vector<16x256xf32>
    %9 = arith.truncf %8 : vector<16x256xf32> to vector<16x256xbf16>
    %c0_6 = arith.constant 0 : index
    %c0_7 = arith.constant 0 : index
    %10 = vector.load %arg4[%c0_6, %c0_7] : memref<256x128xbf16, #tpu.memory_space<vmem>>, vector<256x128xbf16>
    %cst_8 = arith.constant dense<0.000000e+00> : vector<16x128xf32>
    %11 = tpu.matmul %9, %10, %cst_8 {dimension_numbers = #tpu.dot_dimension_numbers<[1], [0], [0], [1], [0, 0, 1, 1], [], []>} : vector<16x256xbf16>, vector<256x128xbf16>, vector<16x128xf32> -> vector<16x128xf32>
    %c0_9 = arith.constant 0 : index
    %c0_10 = arith.constant 0 : index
    %12 = vector.load %arg5[%c0_9, %c0_10] : memref<1x128xf32, #tpu.memory_space<vmem>>, vector<1x128xf32>
    %13 = vector.broadcast %12 : vector<1x128xf32> to vector<16x128xf32>
    %14 = arith.addf %11, %13 : vector<16x128xf32>
    %cst_11 = arith.constant 0.000000e+00 : f32
    %15 = vector.broadcast %cst_11 : f32 to vector<16x128xf32>
    %16 = arith.maximumf %14, %15 : vector<16x128xf32>
    %17 = arith.truncf %16 : vector<16x128xf32> to vector<16x128xbf16>
    %c0_12 = arith.constant 0 : index
    %c0_13 = arith.constant 0 : index
    %18 = vector.load %arg6[%c0_12, %c0_13] : memref<128x4xbf16, #tpu.memory_space<vmem>>, vector<128x4xbf16>
    %cst_14 = arith.constant dense<0.000000e+00> : vector<16x4xf32>
    %19 = tpu.matmul %17, %18, %cst_14 {dimension_numbers = #tpu.dot_dimension_numbers<[1], [0], [0], [1], [0, 0, 1, 1], [], []>} : vector<16x128xbf16>, vector<128x4xbf16>, vector<16x4xf32> -> vector<16x4xf32>
    %c0_15 = arith.constant 0 : index
    %c0_16 = arith.constant 0 : index
    %20 = vector.load %arg7[%c0_15, %c0_16] : memref<1x4xf32, #tpu.memory_space<vmem>>, vector<1x4xf32>
    %21 = vector.broadcast %20 : vector<1x4xf32> to vector<16x4xf32>
    %22 = arith.addf %19, %21 : vector<16x4xf32>
    %c0_17 = arith.constant 0 : index
    %c0_18 = arith.constant 0 : index
    %23 = vector.load %arg8[%c0_17, %c0_18] : memref<16x4xf32, #tpu.memory_space<vmem>>, vector<16x4xf32>
    tpu.vector_store %arg8[%c0_17, %c0_18], %22 {strides = array<i32>} : memref<16x4xf32, #tpu.memory_space<vmem>>, vector<16x4xf32>,
    return
  }
  func.func @transform_0(%arg0: i32) -> (i32, i32) {
    %c0_i32 = arith.constant 0 : i32
    %c0_i32_0 = arith.constant 0 : i32
    return %arg0, %c0_i32 : i32, i32
  }
  func.func @transform_1(%arg0: i32) -> (i32, i32) {
    %c0_i32 = arith.constant 0 : i32
    %c0_i32_0 = arith.constant 0 : i32
    %c0_i32_1 = arith.constant 0 : i32
    return %c0_i32, %c0_i32_0 : i32, i32
  }
  func.func @transform_2(%arg0: i32) -> (i32, i32) {
    %c0_i32 = arith.constant 0 : i32
    %c0_i32_0 = arith.constant 0 : i32
    %c0_i32_1 = arith.constant 0 : i32
    return %c0_i32, %c0_i32_0 : i32, i32
  }
  func.func @transform_3(%arg0: i32) -> (i32, i32) {
    %c0_i32 = arith.constant 0 : i32
    %c0_i32_0 = arith.constant 0 : i32
    %c0_i32_1 = arith.constant 0 : i32
    return %c0_i32, %c0_i32_0 : i32, i32
  }
  func.func @transform_4(%arg0: i32) -> (i32, i32) {
    %c0_i32 = arith.constant 0 : i32
    %c0_i32_0 = arith.constant 0 : i32
    %c0_i32_1 = arith.constant 0 : i32
    return %c0_i32, %c0_i32_0 : i32, i32
  }
  func.func @transform_5(%arg0: i32) -> (i32, i32) {
    %c0_i32 = arith.constant 0 : i32
    %c0_i32_0 = arith.constant 0 : i32
    %c0_i32_1 = arith.constant 0 : i32
    return %c0_i32, %c0_i32_0 : i32, i32
  }
  func.func @transform_6(%arg0: i32) -> (i32, i32) {
    %c0_i32 = arith.constant 0 : i32
    %c0_i32_0 = arith.constant 0 : i32
    %c0_i32_1 = arith.constant 0 : i32
    return %c0_i32, %c0_i32_0 : i32, i32
  }
  func.func @transform_7(%arg0: i32) -> (i32, i32) {
    %c0_i32 = arith.constant 0 : i32
    %c0_i32_0 = arith.constant 0 : i32
    return %arg0, %c0_i32 : i32, i32
  }
}

</mosaic_0001>

<bundles_post_ra>
// kernel: tpu_custom_call.1
= control target key start
LH: loop header
LB: loop body
LE: loop exit
PB: predicated region body
PF: predicated region fallthrough
CT: control target
= control target key end

     0   :  { %12 = vsyncpa [#allocation3], 0  ;;  %s1067_s0 = inlined_call_operand.vmem [shape: f32[2,256], index: 0, kind: input, shape index: {}]   ;;  %s1068_s1 = inlined_call_operand.hbm [shape: bf16[256,256], index: 1, kind: input, shape index: {}]   ;;  %s1069_s2 = inlined_call_operand.vmem [shape: f32[1,256], index: 2, kind: input, shape index: {}]   ;;  %s1070_s3 = inlined_call_operand.hbm [shape: bf16[256,128], index: 3, kind: input, shape index: {}]   ;;  %s1071_s4 = inlined_call_operand.vmem [shape: f32[1,128], index: 4, kind: input, shape index: {}]   ;;  %s1072_s5 = inlined_call_operand.vmem [shape: bf16[128,4], index: 5, kind: input, shape index: {}]   ;;  %s1073_s6 = inlined_call_operand.vmem [shape: f32[1,4], index: 6, kind: input, shape index: {}]   ;;  %s1074_s7 = inlined_call_operand.hbm [shape: f32[2,4], index: 7, kind: output, shape index: {}]  }
   0x1   :  { %13 = vsyncpa [#allocation6], 0 }
   0x2   :  { %14 = vsyncpa [#allocation4], 0  ;;  %s946_s24 = smov [#allocation2]  }
   0x3   :  { %s22_s25 = sshll.u32 %s946_s24, 4  ;;  %s23_s25 = int_to_ptr.vmem [resolvable:$true] %s22_s25 }
   0x4   :  { %s888_s26 = scalar_lea.vmem %s23_s25, 4096  ;;  %p893_p1 = scmp.lt.s32.totalorder %s23_s25, %s23_s25 }
   0x5   :  { %p889_p0 = scmp.ne.s32.totalorder %s23_s25, %s888_s26  ;;  %p894_p2 = scmp.lt.s32.totalorder %s888_s26, %s888_s26 }
   0x7   :  { %p895_p3 = por %p894_p2, %p893_p1 }
   0x9   :  { %p896_p4 = pnand %p895_p3, %p889_p0 }
   0xb   :  { %899 = shalt.err (!%p896_p4)
}
   0xc   :  { %s947_s27 = smov 128   ;;  %s948_s28 = smov 8  }
   0xd   :  { %28 = dma.hbm_to_vmem [thread:$0]  %s1068_s1, 4096, %s23_s25, [#allocation3], %s947_s27, %s947_s27, %s948_s28  }
   0xe   :  { %s949_s8 = smov [#allocation5]  }
   0xf   :  { %s36_s9 = sshll.u32 %s949_s8, 4  ;;  %s37_s9 = int_to_ptr.vmem [resolvable:$true] %s36_s9 }
  0x10   :  { %s908_s10 = scalar_lea.vmem %s37_s9, 2048  ;;  %p913_p6 = scmp.lt.s32.totalorder %s37_s9, %s37_s9 }
  0x11   :  { %p909_p5 = scmp.ne.s32.totalorder %s37_s9, %s908_s10  ;;  %p914_p7 = scmp.lt.s32.totalorder %s908_s10, %s908_s10 }
  0x13   :  { %p915_p8 = por %p914_p7, %p913_p6 }
  0x15   :  { %p916_p9 = pnand %p915_p8, %p909_p5 }
  0x17   :  { %919 = shalt.err (!%p916_p9)
}
  0x18   :  { %s950_s11 = smov 64   ;;  %s951_s12 = smov 4  }
  0x19   :  { %42 = dma.hbm_to_vmem [thread:$0]  %s1070_s3, 2048, %s37_s9, [#allocation6], %s950_s11, %s950_s11, %s951_s12  }
  0x1a   :  { %940 = dma.done.wait [#allocation3], 4096  }
  0x1b   :  { %941 = vsyncadd [#allocation3], 4294963200 }
  0x1c   :  { %942 = dma.done.wait [#allocation6], 2048  }
  0x1d   :  { %943 = vsyncadd [#allocation6], 4294965248  ;;  %v800_v0 = vld [vmem:[#allocation2 + $0x74] ss:$8 sps:$4 sm:$0xff]   ;;  %v802_v1 = vld [vmem:[#allocation2 + $0x70] ss:$8 sps:$4 sm:$0xff]   ;;  %v77_v9 = vlaneseq }
  0x1e   :  { %318 = vmatprep.subr.bf16.mxu0 %v800_v0  ;;  %v803_v2 = vld [vmem:[#allocation2 + $0x64] ss:$8 sps:$4 sm:$0xff]   ;;  %v805_v3 = vld [vmem:[#allocation2 + $0x60] ss:$8 sps:$4 sm:$0xff]   ;;  %v806_v4 = vld [vmem:[#allocation2 + $0x54] ss:$8 sps:$4 sm:$0xff]  }
  0x1f   :  { %319 = vmatpush1.bf16.msra.mxu0 %v802_v1  ;;  %v808_v5 = vld [vmem:[#allocation2 + $0x50] ss:$8 sps:$4 sm:$0xff]   ;;  %v809_v6 = vld [vmem:[#allocation2 + $0x44] ss:$8 sps:$4 sm:$0xff]   ;;  %v811_v7 = vld [vmem:[#allocation2 + $0x40] ss:$8 sps:$4 sm:$0xff]  }
  0x20   :  { %320 = vmatprep.subr.bf16.mxu0 %v803_v2  ;;  %v812_v8 = vld [vmem:[#allocation2 + $0x34] ss:$8 sps:$4 sm:$0xff]   ;;  %v814_v10 = vld [vmem:[#allocation2 + $0x30] ss:$8 sps:$4 sm:$0xff]   ;;  %v815_v11 = vld [vmem:[#allocation2 + $0x24] ss:$8 sps:$4 sm:$0xff]  }
  0x21   :  { %v1003_v12 = vshrl.u32 %v77_v9, 7  ;;  %v817_v13 = vld [vmem:[#allocation2 + $0x20] ss:$8 sps:$4 sm:$0xff]   ;;  %v818_v14 = vld [vmem:[#allocation2 + $0x14] ss:$8 sps:$4 sm:$0xff]   ;;  %v952_v60 = vmov 0.0  }
  0x22   :  { %v820_v15 = vld [vmem:[#allocation2 + $0x10] ss:$8 sps:$4 sm:$0xff]   ;;  %v821_v16 = vld [vmem:[#allocation2 + $0x4] ss:$8 sps:$4 sm:$0xff]   ;;  %v823_v20 = vld [vmem:[#allocation2] ss:$8 sps:$4 sm:$0xff]  }
  0x23   :  { %321 = vmatpush1.bf16.msra.mxu0 %v805_v3  ;;  %v1008_v17 = vld.sshfl [vmem:[%s1067_s0] sm:$0xff pattern:$0x76325410]  ;;  %v1013_v18 = vld.sshfl [vmem:[%s1067_s0 + $0x8] sm:$0xff pattern:$0x76325410] }
  0x24   :  { %322 = vmatprep.subr.bf16.mxu0 %v806_v4  ;;  %v1018_v19 = vld.sshfl [vmem:[%s1067_s0 + $0x10] sm:$0xff pattern:$0x76325410]  ;;  %v879_v21 = vld.sshfl [vmem:[%s1067_s0 + $0x18] sm:$0xff pattern:$0x76325410]  ;;  %v89_v25 = vcombine.high %v1008_v17, %v1013_v18  ;;  %v88_v50 = vcombine.low %v1008_v17, %v1013_v18 }
  0x25   :  { %v824_v22 = vld [vmem:[#allocation2 + $0xf4] ss:$8 sps:$4 sm:$0xff]   ;;  %v107_v27 = vcombine.high %v1018_v19, %v879_v21  ;;  %v856_v29 = vld [vmem:[#allocation5 + $0x68] sm:$0xff]   ;;  %v826_v30 = vld [vmem:[#allocation2 + $0xf0] ss:$8 sps:$4 sm:$0xff]   ;;  %v106_v51 = vcombine.low %v1018_v19, %v879_v21  ;;  %v154_v61 = vsub.s32 1, %v1003_v12 }
  0x26   :  { %v852_v23 = vld [vmem:[#allocation5 + $0x78] sm:$0xff]   ;;  %v854_v26 = vld [vmem:[#allocation5 + $0x70] sm:$0xff]   ;;  %v827_v32 = vld [vmem:[#allocation2 + $0xe4] ss:$8 sps:$4 sm:$0xff]   ;;  %v150_v62 = vsub.s32 0, %v1003_v12  ;;  %vm953_vm0 = vmmov 0  }
  0x27   :  { %323 = vmatpush1.bf16.msra.mxu0 %v808_v5  ;;  %v853_v24 = vld [vmem:[#allocation5 + $0x38] sm:$0xff]   ;;  %737 = vmatprep.subr.bf16.mxu1 %v852_v23  ;;  %v855_v28 = vld [vmem:[#allocation5 + $0x30] sm:$0xff]   ;;  %v113_v31 = vpack.c.bf16 %v107_v27, %v89_v25  ;;  %v829_v33 = vld [vmem:[#allocation2 + $0xe0] ss:$8 sps:$4 sm:$0xff]   ;;  %v112_v53 = vpack.c.bf16 %v106_v51, %v88_v50  ;;  %vm658_vm1 = vcmask 31744  }
  0x28   :  { %324 = vmatprep.subr.bf16.mxu0 %v809_v6  ;;  %738 = vmatpush3.bf16.msra.mxu1 %v853_v24  ;;  %v857_v34 = vld [vmem:[#allocation5 + $0x28] sm:$0xff]   ;;  %v858_v35 = vld [vmem:[#allocation5 + $0x60] sm:$0xff]   ;;  %v830_v36 = vld [vmem:[#allocation2 + $0xd4] ss:$8 sps:$4 sm:$0xff]  }
  0x29   :  { %739 = vmatprep.subr.bf16.mxu1 %v854_v26  ;;  %350 = vmatprep.mubr.bf16.mxu0 %v113_v31  ;;  %v859_v37 = vld [vmem:[#allocation5 + $0x20] sm:$0xff]   ;;  %v860_v38 = vld [vmem:[#allocation5 + $0x58] sm:$0xff]   ;;  %v862_v54 = vld [vmem:[#allocation5 + $0x50] sm:$0xff]  }
  0x2a   :  { %v832_v39 = vld [vmem:[#allocation2 + $0xd0] ss:$8 sps:$4 sm:$0xff]   ;;  %v833_v40 = vld [vmem:[#allocation2 + $0xc4] ss:$8 sps:$4 sm:$0xff]   ;;  %v835_v42 = vld [vmem:[#allocation2 + $0xc0] ss:$8 sps:$4 sm:$0xff]  }
  0x2b   :  { %325 = vmatpush1.bf16.msra.mxu0 %v811_v7  ;;  %v861_v41 = vld [vmem:[#allocation5 + $0x18] sm:$0xff]   ;;  %v839_v45 = vld [vmem:[#allocation2 + $0xa4] ss:$8 sps:$4 sm:$0xff]   ;;  %v841_v46 = vld [vmem:[#allocation2 + $0xa0] ss:$8 sps:$4 sm:$0xff]  }
  0x2c   :  { %326 = vmatprep.subr.bf16.mxu0 %v812_v8  ;;  %740 = vmatpush3.bf16.msra.mxu1 %v855_v28  ;;  %v836_v43 = vld [vmem:[#allocation2 + $0xb4] ss:$8 sps:$4 sm:$0xff]   ;;  %v838_v44 = vld [vmem:[#allocation2 + $0xb0] ss:$8 sps:$4 sm:$0xff]   ;;  %v845_v49 = vld [vmem:[#allocation2 + $0x84] ss:$8 sps:$4 sm:$0xff]  }
  0x2d   :  { %741 = vmatprep.subr.bf16.mxu1 %v856_v29  ;;  %v842_v47 = vld [vmem:[#allocation2 + $0x94] ss:$8 sps:$4 sm:$0xff]   ;;  %v844_v48 = vld [vmem:[#allocation2 + $0x90] ss:$8 sps:$4 sm:$0xff]   ;;  %v847_v52 = vld [vmem:[#allocation2 + $0x80] ss:$8 sps:$4 sm:$0xff]  }
  0x2e   :  { %v863_v55 = vld [vmem:[#allocation5 + $0x10] sm:$0xff]   ;;  %v864_v56 = vld [vmem:[#allocation5 + $0x48] sm:$0xff]   ;;  %v866_v58 = vld [vmem:[#allocation5 + $0x40] sm:$0xff]  }
  0x2f   :  { %327 = vmatpush1.bf16.msra.mxu0 %v814_v10  ;;  %v865_v57 = vld [vmem:[#allocation5 + $0x8] sm:$0xff]   ;;  %v867_v59 = vld [vmem:[#allocation5] sm:$0xff]   ;;  %v868_v12 = vld [vmem:[%s1072_s5 + $0x38] sm:$0xff]  }
  0x30   :  { %328 = vmatprep.subr.bf16.mxu0 %v815_v11  ;;  %742 = vmatpush3.bf16.msra.mxu1 %v857_v34  ;;  %v146_v63 = vld [vmem:[%s1069_s2] sm:$0x3]  ;;  %v869_v17 = vld [vmem:[%s1072_s5 + $0x30] sm:$0xff]   ;;  %v870_v18 = vld [vmem:[%s1072_s5 + $0x28] sm:$0xff]  }
  0x31   :  { %743 = vmatprep.subr.bf16.mxu1 %v858_v35  ;;  %v155_v1 = vrot.slane %v146_v63, %v154_v61  ;;  %v151_v2 = vrot.slane %v146_v63, %v150_v62  ;;  %v871_v19 = vld [vmem:[%s1072_s5 + $0x20] sm:$0xff]   ;;  %v873_v21 = vld [vmem:[%s1072_s5 + $0x10] sm:$0xff]  }
  0x32   :  { %v875_v23 = vld [vmem:[%s1072_s5] sm:$0xff]  }
  0x33   :  { %329 = vmatpush1.bf16.msra.mxu0 %v817_v13  ;;  %v711_v27 = vld [vmem:[%s1071_s4] ss:$0 sm:$0xff] }
  0x34   :  { %330 = vmatprep.subr.bf16.mxu0 %v818_v14  ;;  %744 = vmatpush3.bf16.msra.mxu1 %v859_v37 }
  0x35   :  { %745 = vmatprep.subr.bf16.mxu1 %v860_v38 }
  0x37   :  { %331 = vmatpush1.bf16.msra.mxu0 %v820_v15 }
  0x38   :  { %332 = vmatprep.subr.bf16.mxu0 %v821_v16  ;;  %746 = vmatpush3.bf16.msra.mxu1 %v861_v41 }
  0x39   :  { %747 = vmatprep.subr.bf16.mxu1 %v862_v54 }
  0x3b   :  { %333 = vmatpush1.bf16.msra.mxu0 %v823_v20  ;;  %v872_v20 = vld [vmem:[%s1072_s5 + $0x18] sm:$0xff]  }
  0x3c   :  { %334 = vmatprep.subr.bf16.mxu0 %v824_v22  ;;  %748 = vmatpush3.bf16.msra.mxu1 %v863_v55  ;;  %v874_v22 = vld [vmem:[%s1072_s5 + $0x8] sm:$0xff]  }
  0x3d   :  { %749 = vmatprep.subr.bf16.mxu1 %v864_v56 }
  0x3f   :  { %335 = vmatpush2.bf16.msra.mxu0 %v826_v30 }
  0x40   :  { %336 = vmatprep.subr.bf16.mxu0 %v827_v32  ;;  %750 = vmatpush3.bf16.msra.mxu1 %v865_v57 }
  0x41   :  { %751 = vmatprep.subr.bf16.mxu1 %v866_v58 }
  0x43   :  { %337 = vmatpush2.bf16.msra.mxu0 %v829_v33 }
  0x44   :  { %338 = vmatprep.subr.bf16.mxu0 %v830_v36  ;;  %752 = vmatpush3.bf16.msra.mxu1 %v867_v59  ;;  %v728_v36 = vld [vmem:[%s1073_s6] ss:$0 sm:$0xff] }
  0x45   :  { %768 = vmatprep.subr.bf16.mxu1 %v952_v60 }
  0x47   :  { %339 = vmatpush2.bf16.msra.mxu0 %v832_v39 }
  0x48   :  { %340 = vmatprep.subr.bf16.mxu0 %v833_v40 }
  0x4b   :  { %341 = vmatpush2.bf16.msra.mxu0 %v835_v42 }
  0x4c   :  { %342 = vmatprep.subr.bf16.mxu0 %v836_v43 }
  0x4f   :  { %343 = vmatpush2.bf16.msra.mxu0 %v838_v44 }
  0x50   :  { %344 = vmatprep.subr.bf16.mxu0 %v839_v45 }
  0x53   :  { %345 = vmatpush2.bf16.msra.mxu0 %v841_v46 }
  0x54   :  { %346 = vmatprep.subr.bf16.mxu0 %v842_v47 }
  0x57   :  { %347 = vmatpush2.bf16.msra.mxu0 %v844_v48 }
  0x58   :  { %348 = vmatprep.subr.bf16.mxu0 %v845_v49 }
  0x5b   :  { %349 = vmatpush2.bf16.msra.mxu0 %v847_v52 }
  0x5e   :  { %351 = vmatmul.mubr.bf16.vlgmr.msra.gmra.mxu0 %v112_v53 }
 0x11e   :  { %v352_v0 = vpop.f32.mrf.mxu0 }
 0x11f   :  { %v353_v7 = vadd.f32 %v352_v0, %v151_v2 }
 0x120   :  { %v354_v3 = vpop.f32.mrf.mxu0 }
 0x121   :  { %v355_v5 = vadd.f32 %v354_v3, %v155_v1  ;;  %v361_v14 = vmax.f32 %v353_v7, 0.0 }
 0x122   :  { %v356_v4 = vpop.f32.mrf.mxu0 }
 0x123   :  { %v357_v6 = vadd.f32 %v356_v4, %v151_v2  ;;  %v362_v11 = vmax.f32 %v355_v5, 0.0 }
 0x124   :  { %v358_v8 = vpop.f32.mrf.mxu0 }
 0x125   :  { %v359_v9 = vadd.f32 %v358_v8, %v155_v1  ;;  %v363_v10 = vmax.f32 %v357_v6, 0.0 }
 0x127   :  { %v364_v13 = vmax.f32 %v359_v9, 0.0  ;;  %v365_v16 = vpack.c.bf16 %v363_v10, %v361_v14 }
 0x129   :  { %v366_v15 = vpack.c.bf16 %v364_v13, %v362_v11 }
 0x12b   :  { %534 = vmatprep.mubr.bf16.mxu1 %v366_v15 }
 0x12c   :  { %535 = vmatmul.mubr.bf16.vlgmr.msra.gmra.mxu1 %v365_v16 }
 0x12d   :  { %769 = vmatpush3.bf16.msra.mxu1 %v868_v12  ;;  %784 = vmatprep.mubr.msk.bf16.mxu1 %vm953_vm0, %v952_v60 }
 0x12e   :  { %770 = vmatprep.subr.bf16.mxu1 %v952_v60 }
 0x131   :  { %771 = vmatpush3.bf16.msra.mxu1 %v869_v17 }
 0x132   :  { %772 = vmatprep.subr.bf16.mxu1 %v952_v60 }
 0x135   :  { %773 = vmatpush3.bf16.msra.mxu1 %v870_v18 }
 0x136   :  { %774 = vmatprep.subr.bf16.mxu1 %v952_v60 }
 0x139   :  { %775 = vmatpush3.bf16.msra.mxu1 %v871_v19 }
 0x13a   :  { %776 = vmatprep.subr.bf16.mxu1 %v952_v60 }
 0x13d   :  { %777 = vmatpush3.bf16.msra.mxu1 %v872_v20 }
 0x13e   :  { %778 = vmatprep.subr.bf16.mxu1 %v952_v60 }
 0x141   :  { %779 = vmatpush3.bf16.msra.mxu1 %v873_v21 }
 0x142   :  { %780 = vmatprep.subr.bf16.mxu1 %v952_v60 }
 0x145   :  { %781 = vmatpush3.bf16.msra.mxu1 %v874_v22 }
 0x146   :  { %782 = vmatprep.subr.bf16.mxu1 %v952_v60 }
 0x149   :  { %783 = vmatpush3.bf16.msra.mxu1 %v875_v23 }
 0x1ec   :  { %v753_v24 = vpop.f32.mrf.mxu1 }
 0x1ee   :  { %v754_v25 = vpop.f32.mrf.mxu1 }
 0x1ef   :  { %v755_v26 = vadd.f32 %v754_v25, %v753_v24 }
 0x1f0   :  { %v756_v28 = vpop.f32.mrf.mxu1 }
 0x1f1   :  { %v537_v30 = vadd.f32 %v755_v26, %v711_v27 }
 0x1f2   :  { %v757_v29 = vpop.f32.mrf.mxu1 }
 0x1f3   :  { %v758_v31 = vadd.f32 %v757_v29, %v756_v28  ;;  %v543_v33 = vmax.f32 %v537_v30, 0.0 }
 0x1f5   :  { %v540_v32 = vadd.f32 %v758_v31, %v711_v27 }
 0x1f7   :  { %v544_v34 = vmax.f32 %v540_v32, 0.0 }
 0x1f9   :  { %v545_v35 = vpack.c.bf16 %v544_v34, %v543_v33 }
 0x1fb   :  { %785 = vmatmul.mubr.bf16.vlgmr.msra.gmra.mxu1 %v545_v35 }
 0x2bb   :  { %v651_v37 = vpop.f32.mrf.mxu1 }
 0x2bc   :  { %v652_v38 = vadd.f32 %v728_v36, %v651_v37 }
 0x2bd   :  { %v786_v39 = vpop.f32.mrf.mxu1 }
 0x2be   :  { %659 = vst.msk [vmem:[#allocation7] sm:$0xff] %vm658_vm1, %v652_v38 }
 0x2bf   :  { %v654_v40 = vpop.f32.mrf.mxu1 }
 0x2c0   :  { %v655_v41 = vadd.f32 %v728_v36, %v654_v40 }
 0x2c1   :  { %v787_v42 = vpop.f32.mrf.mxu1 }
 0x2c2   :  { %660 = vst.msk [vmem:[#allocation7 + $0x8] sm:$0xff] %vm658_vm1, %v655_v41 }
 0x2c3   :  { %665 = vsyncadd [#allocation4], 224  ;;  %s954_s4 = smov [#allocation7]  }
 0x2c4   :  { %s666_s15 = sshll.u32 %s954_s4, 4  ;;  %s667_s15 = int_to_ptr.vmem [resolvable:$true] %s666_s15 }
 0x2c5   :  { %s920_s16 = scalar_lea.vmem %s667_s15, 32  ;;  %s924_s17 = scalar_lea.vmem %s667_s15, 256 }
 0x2c6   :  { %p921_p10 = scmp.ne.s32.totalorder %s667_s15, %s920_s16  ;;  %p925_p11 = scmp.lt.s32.totalorder %s667_s15, %s667_s15 }
 0x2c7   :  { %p926_p12 = scmp.lt.s32.totalorder %s924_s17, %s920_s16 }
 0x2c9   :  { %p927_p13 = por %p926_p12, %p925_p11 }
 0x2cb   :  { %p928_p0 = pnand %p927_p13, %p921_p10 }
 0x2cd   :  { %931 = shalt.err (!%p928_p0)
}
 0x2ce   :  { %s955_s6 = smov 32   ;;  %s956_s18 = smov 2  }
 0x2cf   :  { %672 = dma.vmem_to_hbm [thread:$0]  %s667_s15, 32, %s1074_s7, [#allocation4], %s955_s6, %s955_s6, %s956_s18  }
 0x2d0   :  { %944 = dma.done.wait [#allocation4], 256  }
 0x2d1   :  { %945 = vsyncadd [#allocation4], 4294967040 }
 0x2d2   :  { %676 = vsyncpa [#allocation3], 1 }
 0x2d3   :  { %677 = vsyncpa [#allocation6], 1 }
 0x2d4   :  { %678 = vsyncpa [#allocation4], 1 }

</bundles_post_ra>
